<compile_context>
chip_gen: v5e
topology: v5e:2x2
jax: 0.10.0
libtpu: 0.0.40
codegen_flags: <defaults>
</compile_context>

<pallas_src>
import math

import jax
import jax.numpy as jnp
from jax.experimental import pallas as pl
from jax.experimental.pallas import tpu as pltpu


# Plain Python constants only: these become jaxpr literals, never captured
# f32[] consts (the previous compile failure).
_TWO_PI = 2.0 * math.pi
_MANT_MASK = 0x007FFFFF   # 23 mantissa bits
_ONE_BITS = 0x3F800000    # bit pattern of 1.0f

_MAX_TILE_ROWS = 2048     # (2, 2048, 128) f32 block = 2 MiB


def _bits_to_uniform(bits):
    """int32/uint32 random bits -> uniform float32 in [0, 1).

    OR the low 23 bits into the exponent of 1.0, bitcast to float32 (giving
    [1, 2)), subtract 1.  The masked pattern is < 2**31 so this works for
    either signedness of the incoming bits.
    """
    mant = jnp.bitwise_and(bits, _MANT_MASK)
    fbits = jnp.bitwise_or(mant, _ONE_BITS)
    return jax.lax.bitcast_convert_type(fbits, jnp.float32) - 1.0


def _box_muller_store(bits0, bits1, mu, sigma, z_ref):
    """Both Box-Muller branches from one (u1, u2) pair; writes two planes."""
    u1 = 1.0 - _bits_to_uniform(bits0)        # in (0, 1]: log() is safe
    u2 = _bits_to_uniform(bits1)              # in [0, 1)
    r = jnp.sqrt(-2.0 * jnp.log(u1))
    theta = _TWO_PI * u2
    sr = sigma * r                            # hoisted scale: one mul per pair
    z_ref[0] = mu + sr * jnp.cos(theta)
    z_ref[1] = mu + sr * jnp.sin(theta)


def _gaussian_prng_kernel(seed_ref, mu_ref, sigma_ref, z_ref):
    """TPU path: in-kernel hardware PRNG, no bits HBM stream."""
    tile_rows = z_ref.shape[1]
    # Distinct seed per grid step (and per TensorCore on v7x).
    pltpu.prng_seed(seed_ref[0] + pl.program_id(0))
    bits0 = pltpu.prng_random_bits((tile_rows, 128))
    bits1 = pltpu.prng_random_bits((tile_rows, 128))
    _box_muller_store(bits0, bits1, mu_ref[0], sigma_ref[0], z_ref)


def _gaussian_bits_kernel(mu_ref, sigma_ref, bits_ref, z_ref):
    """Fallback path (interpret / non-TPU backends): bits streamed from HBM."""
    _box_muller_store(bits_ref[0], bits_ref[1], mu_ref[0], sigma_ref[0], z_ref)


def _choose_tiling(rows_exact):
    """Pick (tile_rows, grid, rows_padded) for the flat (2, rows, 128) layout."""
    if rows_exact < 16:
        # Tiny problem: one full-array block (any shape is legal then), no pad.
        return rows_exact, 1, rows_exact
    rows8 = ((rows_exact + 7) // 8) * 8
    # >= 2 grid steps so both v7x TensorCores get work; 8-aligned tiles.
    tile_rows = min(_MAX_TILE_ROWS, max(8, (rows8 // 2) // 8 * 8))
    grid = (rows8 + tile_rows - 1) // tile_rows
    return tile_rows, grid, grid * tile_rows


def gaussian_prior_sample(n_samples, z_dim, mu, sigma, key, *, use_tpu_prng=None):
    """Pallas equivalent of Gaussian.forward(n_samples)."""
    if use_tpu_prng is None:
        # TODO(synk): drop the fallback once interpret support is not needed.
        use_tpu_prng = jax.default_backend() == "tpu"

    n_total = int(n_samples) * int(z_dim)
    half = (n_total + 1) // 2
    rows_exact = max(1, (half + 127) // 128)        # = cdiv(n_total, 256)
    tile_rows, grid_n, rows_p = _choose_tiling(rows_exact)
    n_out = 2 * rows_p * 128

    mu_arr = jnp.asarray([mu], dtype=jnp.float32)       # nn.Parameter mu
    sigma_arr = jnp.asarray([sigma], dtype=jnp.float32)  # nn.Parameter sigma

    smem_spec = pl.BlockSpec(memory_space=pltpu.MemorySpace.SMEM)
    tile_spec = pl.BlockSpec((2, tile_rows, 128), lambda i: (0, i, 0))
    out_shape = jax.ShapeDtypeStruct((2, rows_p, 128), jnp.float32)
    cparams = pltpu.CompilerParams(dimension_semantics=("parallel",))

    if use_tpu_prng:
        seed = jax.random.randint(key, (1,), 0, jnp.iinfo(jnp.int32).max,
                                  dtype=jnp.int32)
        z_flat = pl.pallas_call(
            _gaussian_prng_kernel,
            out_shape=out_shape,
            grid=(grid_n,),
            in_specs=[smem_spec, smem_spec, smem_spec],
            out_specs=tile_spec,
            compiler_params=cparams,
            cost_estimate=pl.CostEstimate(
                flops=10 * n_out, transcendentals=2 * n_out,
                bytes_accessed=4 * n_out),
        )(seed, mu_arr, sigma_arr)
    else:
        bits = jax.random.bits(key, (2, rows_p, 128), dtype=jnp.uint32)
        z_flat = pl.pallas_call(
            _gaussian_bits_kernel,
            out_shape=out_shape,
            grid=(grid_n,),
            in_specs=[smem_spec, smem_spec, tile_spec],
            out_specs=tile_spec,
            compiler_params=cparams,
            cost_estimate=pl.CostEstimate(
                flops=10 * n_out, transcendentals=2 * n_out,
                bytes_accessed=8 * n_out),
        )(mu_arr, sigma_arr, bits)

    if n_out == n_total:
        # Exact-sized output: reshape is free, no slice copy.
        sample = z_flat.reshape(n_samples, z_dim)
    else:
        sample = z_flat.reshape(-1)[:n_total].reshape(n_samples, z_dim)

    # OneHotCategorical over a single class: every draw is [1.0].
    y_sample = jnp.ones((n_samples, 1), dtype=jnp.float32)
    return y_sample, sample


if __name__ == "__main__":
    # Deterministic "parameters" (module __init__ takes scalar mu, sigma).
    mu = 0.0
    sigma = 1.0

    # Small shapes consistent with the forward pass.
    n_samples = 8   # plays the role of cfg.data.batch_size
    z_dim = 32

    key = jax.random.PRNGKey(0)

    y_sample, sample = gaussian_prior_sample(n_samples, z_dim, mu, sigma, key)
    jax.block_until_ready((y_sample, sample))

    assert y_sample.shape == (n_samples, 1) and y_sample.dtype == jnp.float32
    assert sample.shape == (n_samples, z_dim) and sample.dtype == jnp.float32
    assert bool(jnp.all(y_sample == 1.0))
    assert bool(jnp.all(jnp.isfinite(sample)))
    # Loose sanity check on the 256 N(mu, sigma) draws (bounds are ~8+ SE wide).
    m = float(jnp.mean(sample))
    s = float(jnp.std(sample))
    assert abs(m - mu) < 0.6, m
    assert 0.5 < s < 1.5, s

    print("KERNEL_OK")
</pallas_src>

<mosaic_0001>
module attributes {stable_mosaic.version = 11 : i64} {
  func.func @_gaussian_bits_kernel(%arg0: i32, %arg1: memref<1xf32, #tpu.memory_space<smem>>, %arg2: memref<1xf32, #tpu.memory_space<smem>>, %arg3: memref<2x1x128xi32, #tpu.memory_space<vmem>>, %arg4: memref<2x1x128xf32, #tpu.memory_space<vmem>>) attributes {dimension_semantics = [#tpu.dimension_semantics<parallel>], iteration_bounds = array<i64: 1>, scalar_prefetch = 0 : i64, scratch_operands = 0 : i64, tpu.core_type = #tpu.core_type<tc>, window_params = [{transform_indices = @transform_0, window_bounds = array<i64: 1>}, {transform_indices = @transform_1, window_bounds = array<i64: 1>}, {transform_indices = @transform_2, window_bounds = array<i64: 2, 1, 128>}, {transform_indices = @transform_3, window_bounds = array<i64: 2, 1, 128>}]} {
    %c0 = arith.constant 0 : index
    %c0_0 = arith.constant 0 : index
    %c0_1 = arith.constant 0 : index
    %0 = vector.load %arg3[%c0, %c0_0, %c0_1] : memref<2x1x128xi32, #tpu.memory_space<vmem>>, vector<1x1x128xi32>
    %1 = vector.shape_cast %0 : vector<1x1x128xi32> to vector<1x128xi32>
    %c1 = arith.constant 1 : index
    %c0_2 = arith.constant 0 : index
    %c0_3 = arith.constant 0 : index
    %2 = vector.load %arg3[%c1, %c0_2, %c0_3] : memref<2x1x128xi32, #tpu.memory_space<vmem>>, vector<1x1x128xi32>
    %3 = vector.shape_cast %2 : vector<1x1x128xi32> to vector<1x128xi32>
    %c0_4 = arith.constant 0 : index
    %4 = memref.load %arg1[%c0_4] : memref<1xf32, #tpu.memory_space<smem>>
    %c0_5 = arith.constant 0 : index
    %5 = memref.load %arg2[%c0_5] : memref<1xf32, #tpu.memory_space<smem>>
    %c8388607_i32 = arith.constant 8388607 : i32
    %6 = vector.broadcast %c8388607_i32 : i32 to vector<1x128xi32>
    %7 = arith.andi %1, %6 : vector<1x128xi32>
    %c1065353216_i32 = arith.constant 1065353216 : i32
    %8 = vector.broadcast %c1065353216_i32 : i32 to vector<1x128xi32>
    %9 = arith.ori %7, %8 : vector<1x128xi32>
    %10 = tpu.bitcast %9 : vector<1x128xi32> -> vector<1x128xf32>
    %cst = arith.constant 1.000000e+00 : f32
    %11 = vector.broadcast %cst : f32 to vector<1x128xf32>
    %12 = arith.subf %10, %11 : vector<1x128xf32>
    %cst_6 = arith.constant 1.000000e+00 : f32
    %13 = vector.broadcast %cst_6 : f32 to vector<1x128xf32>
    %14 = arith.subf %13, %12 : vector<1x128xf32>
    %c8388607_i32_7 = arith.constant 8388607 : i32
    %15 = vector.broadcast %c8388607_i32_7 : i32 to vector<1x128xi32>
    %16 = arith.andi %3, %15 : vector<1x128xi32>
    %c1065353216_i32_8 = arith.constant 1065353216 : i32
    %17 = vector.broadcast %c1065353216_i32_8 : i32 to vector<1x128xi32>
    %18 = arith.ori %16, %17 : vector<1x128xi32>
    %19 = tpu.bitcast %18 : vector<1x128xi32> -> vector<1x128xf32>
    %cst_9 = arith.constant 1.000000e+00 : f32
    %20 = vector.broadcast %cst_9 : f32 to vector<1x128xf32>
    %21 = arith.subf %19, %20 : vector<1x128xf32>
    %22 = math.log %14 : vector<1x128xf32>
    %cst_10 = arith.constant -2.000000e+00 : f32
    %23 = vector.broadcast %cst_10 : f32 to vector<1x128xf32>
    %24 = arith.mulf %23, %22 : vector<1x128xf32>
    %25 = math.sqrt %24 : vector<1x128xf32>
    %cst_11 = arith.constant 6.28318548 : f32
    %26 = vector.broadcast %cst_11 : f32 to vector<1x128xf32>
    %27 = arith.mulf %26, %21 : vector<1x128xf32>
    %28 = vector.broadcast %5 : f32 to vector<1x128xf32>
    %29 = arith.mulf %28, %25 : vector<1x128xf32>
    %30 = math.cos %27 : vector<1x128xf32>
    %31 = arith.mulf %29, %30 : vector<1x128xf32>
    %32 = vector.broadcast %4 : f32 to vector<1x128xf32>
    %33 = arith.addf %32, %31 : vector<1x128xf32>
    %c0_12 = arith.constant 0 : index
    %c0_13 = arith.constant 0 : index
    %c0_14 = arith.constant 0 : index
    %34 = vector.load %arg4[%c0_12, %c0_13, %c0_14] : memref<2x1x128xf32, #tpu.memory_space<vmem>>, vector<1x1x128xf32>
    %35 = vector.shape_cast %34 : vector<1x1x128xf32> to vector<1x128xf32>
    %36 = vector.shape_cast %33 : vector<1x128xf32> to vector<1x1x128xf32>
    tpu.vector_store %arg4[%c0_12, %c0_13, %c0_14], %36 {strides = array<i32>} : memref<2x1x128xf32, #tpu.memory_space<vmem>>, vector<1x1x128xf32>,
    %37 = math.sin %27 : vector<1x128xf32>
    %38 = arith.mulf %29, %37 : vector<1x128xf32>
    %39 = vector.broadcast %4 : f32 to vector<1x128xf32>
    %40 = arith.addf %39, %38 : vector<1x128xf32>
    %c1_15 = arith.constant 1 : index
    %c0_16 = arith.constant 0 : index
    %c0_17 = arith.constant 0 : index
    %41 = vector.load %arg4[%c1_15, %c0_16, %c0_17] : memref<2x1x128xf32, #tpu.memory_space<vmem>>, vector<1x1x128xf32>
    %42 = vector.shape_cast %41 : vector<1x1x128xf32> to vector<1x128xf32>
    %43 = vector.shape_cast %40 : vector<1x128xf32> to vector<1x1x128xf32>
    tpu.vector_store %arg4[%c1_15, %c0_16, %c0_17], %43 {strides = array<i32>} : memref<2x1x128xf32, #tpu.memory_space<vmem>>, vector<1x1x128xf32>,
    return
  }
  func.func @transform_0(%arg0: i32) -> i32 {
    %c0_i32 = arith.constant 0 : i32
    %c0_i32_0 = arith.constant 0 : i32
    return %c0_i32 : i32
  }
  func.func @transform_1(%arg0: i32) -> i32 {
    %c0_i32 = arith.constant 0 : i32
    %c0_i32_0 = arith.constant 0 : i32
    return %c0_i32 : i32
  }
  func.func @transform_2(%arg0: i32) -> (i32, i32, i32) {
    %c0_i32 = arith.constant 0 : i32
    %c0_i32_0 = arith.constant 0 : i32
    %c0_i32_1 = arith.constant 0 : i32
    return %c0_i32, %arg0, %c0_i32_0 : i32, i32, i32
  }
  func.func @transform_3(%arg0: i32) -> (i32, i32, i32) {
    %c0_i32 = arith.constant 0 : i32
    %c0_i32_0 = arith.constant 0 : i32
    %c0_i32_1 = arith.constant 0 : i32
    return %c0_i32, %arg0, %c0_i32_0 : i32, i32, i32
  }
}

</mosaic_0001>

<bundles_post_ra>
// kernel: tpu_custom_call.1
= control target key start
LH: loop header
LB: loop body
LE: loop exit
PB: predicated region body
PF: predicated region fallthrough
CT: control target
= control target key end

     0   :  { %10 = vsyncpa [#allocation5], 0  ;;  %v433_v16 = vmov 683565275   ;;  %v434_v18 = vmov 2475754826   ;;  %s524_s0 = inlined_call_operand.<no memory space> [shape: f32[1], index: 0, kind: input, shape index: {}]   ;;  %s525_s1 = inlined_call_operand.<no memory space> [shape: f32[1], index: 1, kind: input, shape index: {}]   ;;  %s526_s2 = inlined_call_operand.vmem [shape: u32[2,1,128], index: 2, kind: input, shape index: {}]   ;;  %s527_s3 = inlined_call_operand.hbm [shape: f32[2,1,128], index: 3, kind: output, shape index: {}]  }
   0x1   :  { %v384_v0 = vld [vmem:[%s526_s2 + $0x1] sm:$0x1]  ;;  %v435_v20 = vmov 2131351028   ;;  %v436_v22 = vmov 2102212464  }
   0x2   :  { %v27_v1 = vand.u32 8388607, %v384_v0  ;;  %v437_v24 = vmov 920167782   ;;  %v438_v30 = vmov 1326507024  }
   0x3   :  { %v17_v33 = vld [vmem:[%s526_s2] sm:$0x1]  ;;  %s372_s22 = sshll.u32 %s527_s3, 4  ;;  %s441_s23 = smov 16   ;;  %s373_s22 = int_to_ptr.hbm [resolvable:$true] %s372_s22 }
   0x4   :  { %v28_v2 = vor.u32 1065353216, %v27_v1  ;;  %v22_v40 = vand.u32 8388607, %v17_v33  ;;  %s442_s24 = smov 1  }
   0x6   :  { %v386_v3 = vadd.f32 -1.0, %v28_v2  ;;  %v23_v53 = vor.u32 1065353216, %v22_v40 }
   0x8   :  { %v466_v4 = vmul.f32 6.2831855, %v386_v3  ;;  %v385_v1 = vadd.f32 -1.0, %v23_v53 }
   0xa   :  { %v52_v5 = vand.u32 2139095040, %v466_v4  ;;  %v49_v7 = vand.u32 2147483647, %v466_v4  ;;  %vm51_vm12 = vcmp.lt.s32.totalorder %v466_v4, 0 }
   0xc   :  { %v53_v6 = vshrl.u32 %v52_v5, 23  ;;  %v56_v10 = vand.u32 8388607, %v49_v7  ;;  %vm50_vm13 = vcmp.le.f32.partialorder %v49_v7, 0.7853982 }
   0xe   :  { %v387_v8 = vadd.s32 4294967169, %v53_v6  ;;  %v57_v13 = vor.u32 8388608, %v56_v10  ;;  %v439_v10 = vmov 0  }
  0x10   :  { %v59_v9 = vadd.s32 1, %v387_v8  ;;  %v475_v32 = vshll.u32 %v57_v13, 8 }
  0x12   :  { %vm60_vm0 = vcmp.gt.s32.totalorder %v59_v9, 0  ;;  %v98_v46 = vand.u32 65535, %v475_v32  ;;  %v99_v47 = vshrl.u32 %v475_v32, 16 }
  0x13   :  { %v61_v11 = vsel %vm60_vm0, %v59_v9, 0 }
  0x14   :  { %v63_v12 = vand.u32 31, %v61_v11  ;;  %v472_v14 = vshrl.u32 %v61_v11, 5 }
  0x16   :  { %v64_v15 = vsub.s32 32, %v63_v12  ;;  %v66_v17 = vshll.u32 %v433_v16, %v63_v12  ;;  %v69_v19 = vshll.u32 %v434_v18, %v63_v12  ;;  %v72_v21 = vshll.u32 %v435_v20, %v63_v12 }
  0x17   :  { %v75_v23 = vshll.u32 %v436_v22, %v63_v12  ;;  %v78_v25 = vshll.u32 %v437_v24, %v63_v12  ;;  %vm81_vm1 = vcmp.lt.s32.totalorder %v472_v14, 1  ;;  %vm84_vm2 = vcmp.lt.s32.totalorder %v472_v14, 4 }
  0x18   :  { %v67_v26 = vshrl.u32 %v434_v18, %v64_v15  ;;  %v70_v27 = vshrl.u32 %v435_v20, %v64_v15  ;;  %v73_v28 = vshrl.u32 %v436_v22, %v64_v15  ;;  %v76_v29 = vshrl.u32 %v437_v24, %v64_v15 }
  0x19   :  { %v79_v31 = vshrl.u32 %v438_v30, %v64_v15  ;;  %vm83_vm3 = vcmp.lt.s32.totalorder %v472_v14, 3  ;;  %vm82_vm4 = vcmp.lt.s32.totalorder %v472_v14, 2  ;;  %v65_v55 = vshrl.u32 %v433_v16, %v64_v15 }
  0x1a   :  { %v68_v34 = vor.u32 %v67_v26, %v66_v17  ;;  %v71_v35 = vor.u32 %v70_v27, %v69_v19  ;;  %v74_v36 = vor.u32 %v73_v28, %v72_v21  ;;  %v77_v37 = vor.u32 %v76_v29, %v75_v23 }
  0x1b   :  { %v80_v38 = vor.u32 %v79_v31, %v78_v25  ;;  %v26_v26 = vsub.f32 1.0, %v385_v1 }
  0x1c   :  { %v89_v39 = vsel %vm81_vm1, %v68_v34, %v71_v35  ;;  %v90_v41 = vsel %vm84_vm2, %v77_v37, 920167782  ;;  %v93_v42 = vsel %vm81_vm1, %v71_v35, %v74_v36  ;;  %v85_v5 = vsel %vm81_vm1, %v65_v55, %v68_v34 }
  0x1d   :  { %v94_v43 = vsel %vm84_vm2, %v80_v38, 1326507024  ;;  %v91_v44 = vsel %vm83_vm3, %v74_v36, %v90_v41  ;;  %v86_v9 = vsel %vm84_vm2, %v74_v36, 2102212464  ;;  %403 = vlog2.f32 %v26_v26 }
  0x1e   :  { %v95_v45 = vsel %vm83_vm3, %v77_v37, %v94_v43  ;;  %v92_v48 = vsel %vm82_vm4, %v89_v39, %v91_v44  ;;  %v87_v20 = vsel %vm83_vm3, %v71_v35, %v86_v9 }
  0x1f   :  { %v96_v49 = vsel %vm82_vm4, %v93_v42, %v95_v45  ;;  %v122_v52 = vand.u32 65535, %v92_v48  ;;  %v123_v54 = vshrl.u32 %v92_v48, 16  ;;  %v88_v29 = vsel %vm82_vm4, %v85_v5, %v87_v20 }
  0x20   :  { %v100_v50 = vand.u32 65535, %v96_v49  ;;  %v101_v51 = vshrl.u32 %v96_v49, 16  ;;  %v142_v34 = vmul.u32 %v475_v32, %v88_v29 }
  0x21   :  { %v124_v59 = vmul.u32 %v122_v52, %v98_v46  ;;  %v125_v60 = vmul.u32 %v123_v54, %v98_v46  ;;  %v126_v61 = vmul.u32 %v122_v52, %v99_v47  ;;  %v127_v2 = vmul.u32 %v123_v54, %v99_v47 }
  0x22   :  { %v102_v56 = vmul.u32 %v100_v50, %v98_v46  ;;  %v103_v57 = vmul.u32 %v101_v51, %v98_v46  ;;  %v104_v58 = vmul.u32 %v100_v50, %v99_v47  ;;  %v105_v62 = vmul.u32 %v101_v51, %v99_v47 }
  0x23   :  { %v128_v3 = vshll.u32 %v125_v60, 16  ;;  %v130_v8 = vshll.u32 %v126_v61, 16  ;;  %v129_v18 = vshrl.u32 %v125_v60, 16  ;;  %v131_v24 = vshrl.u32 %v126_v61, 16  ;;  %v404_v38 = vpop.eup %403 }
  0x24   :  { %v106_v63 = vshll.u32 %v103_v57, 16  ;;  %v108_v0 = vshll.u32 %v104_v58, 16  ;;  %v107_v13 = vshrl.u32 %v103_v57, 16  ;;  %v109_v21 = vshrl.u32 %v104_v58, 16 }
  0x25   :  { %vm132_vm6 = vc.u32 %v124_v59, %v128_v3  ;;  %v134_v12 = vadd.s32 %v128_v3, %v124_v59  ;;  %v32_v41 = vmul.f32 0.6931472, %v404_v38 }
  0x26   :  { %vm110_vm5 = vc.u32 %v102_v56, %v106_v63  ;;  %v112_v6 = vadd.s32 %v106_v63, %v102_v56  ;;  %v133_v16 = vsel %vm132_vm6, 1, %v439_v10  ;;  %vm192_vm6 = vweird.f32 %v466_v4 }
  0x27   :  { %v111_v11 = vsel %vm110_vm5, 1, %v439_v10  ;;  %v135_v19 = vadd.s32 %v133_v16, %v127_v2  ;;  %vm136_vm8 = vc.u32 %v134_v12, %v130_v8  ;;  %v138_v28 = vadd.s32 %v134_v12, %v130_v8 }
  0x28   :  { %v113_v15 = vadd.s32 %v111_v11, %v105_v62  ;;  %vm114_vm7 = vc.u32 %v112_v6, %v108_v0  ;;  %v137_v23 = vsel %vm136_vm8, 1, %v439_v10  ;;  %v33_v44 = vmul.f32 -2.0, %v32_v41 }
  0x29   :  { %v115_v17 = vsel %vm114_vm7, 1, %v439_v10  ;;  %v139_v25 = vadd.s32 %v137_v23, %v135_v19 }
  0x2a   :  { %v117_v22 = vadd.s32 %v115_v17, %v113_v15  ;;  %405 = vrsqrt.f32 %v33_v44  ;;  %vm41_vm14 = vcmp.eq.f32.partialorder %v33_v44, inf  ;;  %v44_v23 = vand.u32 2147483648, %v33_v44 }
  0x2b   :  { %v140_v30 = vadd.s32 %v139_v25, %v129_v18  ;;  %vm43_vm15 = vcmp.eq.f32.partialorder %v33_v44, 0.0 }
  0x2c   :  { %v118_v27 = vadd.s32 %v117_v22, %v107_v13 }
  0x2d   :  { %v141_v33 = vadd.s32 %v140_v30, %v131_v24  ;;  %v47_v30 = vstv %s525_s1  ;;  %s440_s1 = smov [#allocation4]  }
  0x2e   :  { %v119_v31 = vadd.s32 %v118_v27, %v109_v21  ;;  %s370_s19 = sshll.u32 %s440_s1, 4  ;;  %s371_s19 = int_to_ptr.vmem [resolvable:$true] %s370_s19 }
  0x2f   :  { %v145_v36 = vadd.s32 1, %v141_v33 }
  0x30   :  { %vm144_vm9 = vc.u32 %v119_v31, %v138_v28  ;;  %v143_v48 = vadd.s32 %v138_v28, %v119_v31  ;;  %v406_v49 = vpop.eup %405 }
  0x31   :  { %v146_v35 = vsel %vm144_vm9, %v145_v36, %v141_v33  ;;  %v35_v55 = vmul.f32 %v406_v49, %v33_v44 }
  0x32   :  { %v147_v37 = vadd.s32 %v146_v35, %v142_v34 }
  0x33   :  { %v36_v60 = vmul.f32 %v406_v49, %v35_v55 }
  0x34   :  { %v148_v39 = vadd.s32 536870912, %v147_v37 }
  0x35   :  { %v37_v63 = vmul.f32 0.5, %v36_v60 }
  0x36   :  { %v149_v40 = vshrl.u32 %v148_v39, 30 }
  0x37   :  { %v38_v3 = vsub.f32 1.5, %v37_v63 }
  0x38   :  { %v150_v42 = vshll.u32 %v149_v40, 30  ;;  %v173_v0 = vsub.s32 4, %v149_v40 }
  0x39   :  { %v39_v12 = vmul.f32 %v406_v49, %v38_v3 }
  0x3a   :  { %v151_v43 = vsub.s32 %v147_v37, %v150_v42  ;;  %v174_v5 = vsel %vm51_vm12, %v173_v0, %v149_v40 }
  0x3b   :  { %v176_v9 = vsel %vm50_vm13, 0, %v174_v5  ;;  %v40_v19 = vmul.f32 %v39_v12, %v33_v44 }
  0x3c   :  { %vm152_vm10 = vcmp.lt.s32.totalorder %v151_v43, 0  ;;  %v153_v14 = vsub.s32 0, %v151_v43  ;;  %v351_v16 = vadd.s32 3, %v176_v9  ;;  %v193_v21 = vand.u32 3, %v176_v9 }
  0x3d   :  { %v42_v26 = vsel %vm41_vm14, %v33_v44, %v40_v19 }
  0x3e   :  { %v154_v45 = vsel %vm152_vm10, %v153_v14, %v151_v43  ;;  %v352_v22 = vand.u32 3, %v351_v16  ;;  %vm198_vm0 = vcmp.eq.s32.totalorder %v193_v21, 2  ;;  %v45_v29 = vsel %vm43_vm15, %v44_v23, %v42_v26 }
  0x3f   :  { %v155_v46 = vclz %v154_v45  ;;  %vm194_vm2 = vcmp.lt.s32.totalorder %v193_v21, 2  ;;  %vm195_vm3 = vcmp.eq.s32.totalorder %v193_v21, 0  ;;  %v48_v37 = vmul.f32 %v47_v30, %v45_v29 }
  0x40   :  { %vm357_vm1 = vcmp.eq.s32.totalorder %v352_v22, 2  ;;  %vm354_vm4 = vcmp.eq.s32.totalorder %v352_v22, 0  ;;  %vm353_vm5 = vcmp.lt.s32.totalorder %v352_v22, 2 }
  0x41   :  { %v388_v47 = vadd.s32 4294967294, %v155_v46 }
  0x43   :  { %vm389_vm11 = vcmp.lt.s32.totalorder %v388_v47, 0 }
  0x44   :  { %v158_v32 = vsel %vm389_vm11, 0, %v388_v47 }
  0x45   :  { %v159_v50 = vsub.s32 32, %v158_v32  ;;  %v160_v51 = vshll.u32 %v151_v43, %v158_v32  ;;  %v163_v52 = vsub.s32 4294967266, %v158_v32  ;;  %v204_v43 = vstv %s524_s0 }
  0x47   :  { %v161_v53 = vshrl.u32 %v143_v48, %v159_v50  ;;  %v164_v54 = vadd.s32 127, %v163_v52 }
  0x49   :  { %v162_v56 = vor.u32 %v161_v53, %v160_v51  ;;  %v165_v57 = vshll.u32 %v164_v54, 23 }
  0x4b   :  { %v166_v58 = vor.u32 4788187, %v165_v57  ;;  %v169_v59 = vcvt.s32.f32 %v162_v56 }
  0x4d   :  { %v167_v61 = vand.u32 2147483647, %v166_v58 }
  0x4f   :  { %v170_v62 = vmul.f32 %v169_v59, %v167_v61 }
  0x51   :  { %v171_v1 = vxor.u32 2147483648, %v170_v62 }
  0x53   :  { %v172_v2 = vsel %vm51_vm12, %v171_v1, %v170_v62 }
  0x54   :  { %v175_v6 = vsel %vm50_vm13, %v466_v4, %v172_v2 }
  0x55   :  { %v177_v8 = vmul.f32 %v175_v6, %v175_v6 }
  0x57   :  { %v178_v10 = vmul.f32 -0.001358992, %v177_v8  ;;  %v185_v11 = vmul.f32 -0.00019511016, %v177_v8 }
  0x59   :  { %v179_v13 = vadd.f32 0.041655596, %v178_v10  ;;  %v186_v15 = vadd.f32 0.008332121, %v185_v11 }
  0x5b   :  { %v180_v17 = vmul.f32 %v179_v13, %v177_v8  ;;  %v187_v18 = vmul.f32 %v186_v15, %v177_v8 }
  0x5d   :  { %v181_v20 = vadd.f32 -0.4999988, %v180_v17  ;;  %v188_v7 = vadd.f32 -0.16666654, %v187_v18 }
  0x5f   :  { %v182_v24 = vmul.f32 %v181_v20, %v177_v8  ;;  %v189_v25 = vmul.f32 %v188_v7, %v177_v8 }
  0x61   :  { %v183_v27 = vadd.f32 1.0, %v182_v24  ;;  %v190_v28 = vadd.f32 1.0, %v189_v25 }
  0x63   :  { %v191_v31 = vmul.f32 %v190_v28, %v175_v6  ;;  %v199_v33 = vxor.u32 2147483648, %v183_v27 }
  0x65   :  { %v196_v34 = vxor.u32 2147483648, %v191_v31  ;;  %v200_v36 = vsel %vm198_vm0, %v199_v33, %v191_v31  ;;  %v359_v35 = vsel %vm357_vm1, %v199_v33, %v191_v31 }
  0x67   :  { %v197_v38 = vsel %vm195_vm3, %v183_v27, %v196_v34  ;;  %v356_v39 = vsel %vm354_vm4, %v183_v27, %v196_v34 }
  0x68   :  { %v201_v40 = vsel %vm194_vm2, %v197_v38, %v200_v36  ;;  %v360_v41 = vsel %vm353_vm5, %v356_v39, %v359_v35 }
  0x69   :  { %v202_v42 = vsel %vm192_vm6, nan, %v201_v40  ;;  %v361_v44 = vsel %vm192_vm6, nan, %v360_v41 }
  0x6a   :  { %v203_v14 = vmul.f32 %v202_v42, %v48_v37  ;;  %v362_v45 = vmul.f32 %v361_v44, %v48_v37 }
  0x6c   :  { %v205_v46 = vadd.f32 %v204_v43, %v203_v14  ;;  %v363_v4 = vadd.f32 %v362_v45, %v204_v43 }
  0x6e   :  { %206 = vst [vmem:[#allocation4] sm:$0x1] %v205_v46 }
  0x6f   :  { %365 = vst [vmem:[#allocation4 + $0x1] sm:$0x1] %v363_v4 }
  0x70   :  { %378 = dma.vmem_to_hbm [thread:$0]  %s371_s19, 32, %s373_s22, [#allocation5], %s441_s23, %s441_s23, %s442_s24  }
  0x71   :  { %431 = dma.done.wait [#allocation5], 32  }
  0x72   :  { %432 = vsyncadd [#allocation5], 4294967264 }
  0x73   :  { %383 = vsyncpa [#allocation5], 1 }

</bundles_post_ra>
